<compile_context>
chip_gen: v7x
topology: tpu7x:2x2x1
jax: 0.10.0
libtpu: 0.0.40
codegen_flags: <defaults>
</compile_context>

<pallas_src>
import jax
import jax.numpy as jnp
from jax.experimental import pallas as pl
from jax.experimental.pallas import tpu as pltpu


def _copy_tile_kernel(emb_ref, out_ref):
    # Pure memcpy of one (TILE_L, D) tile; the op is HBM/DMA-bound.
    out_ref[...] = emb_ref[...]


def _choose_tile_rows(L: int, D: int, itemsize: int,
                      vmem_budget_bytes: int = 12 * 1024 * 1024) -> int:
    """Pick a row-tile size: multiple of 8 (or full extent), VMEM-friendly."""
    if L % 8 != 0:
        # Full-extent block is always legal even when not 8-aligned.
        return L
    tile = min(1024, L)            # both are multiples of 8 here
    # Budget: 2 double-buffered input tiles + 2 output tiles.
    while tile > 8 and 4 * tile * D * itemsize > vmem_budget_bytes:
        tile = max(8, (tile // 2) - ((tile // 2) % 8))
    return tile


def positional_embeddings_forward(embedding_table: jax.Array) -> jax.Array:
    """forward() = embedding(arange(L)) == the table itself, via a tiled Pallas copy.

    embedding_table: [context_length, output_dim]
    returns:         [context_length, output_dim] (same dtype)
    """
    L, D = embedding_table.shape
    itemsize = jnp.dtype(embedding_table.dtype).itemsize
    tile_l = _choose_tile_rows(L, D, itemsize)

    grid = (pl.cdiv(L, tile_l),)

    return pl.pallas_call(
        _copy_tile_kernel,
        out_shape=jax.ShapeDtypeStruct((L, D), embedding_table.dtype),
        grid_spec=pl.GridSpec(
            grid=grid,
            in_specs=[pl.BlockSpec((tile_l, D), lambda i: (i, 0))],
            out_specs=pl.BlockSpec((tile_l, D), lambda i: (i, 0)),
        ),
        compiler_params=pltpu.CompilerParams(
            # Tiles are fully independent -> shard across TCs on v7x.
            dimension_semantics=("parallel",),
        ),
    )(embedding_table)


class PositionalEmbeddings:
    """JAX/Pallas port of the PyTorch module (deterministic init, no checkpoint)."""

    def __init__(self, context_length: int, output_dim: int, key=None):
        self.context_length = context_length
        self.output_dim = output_dim
        if key is None:
            key = jax.random.PRNGKey(0)
        # torch.nn.Embedding default init ~ N(0, 1)
        self.embedding_weight = jax.random.normal(
            key, (context_length, output_dim), dtype=jnp.float32)

    def __call__(self) -> jax.Array:
        # positions = arange(context_length) -> gather is the identity,
        # so the forward is a tiled copy of the embedding table.
        return positional_embeddings_forward(self.embedding_weight)


if __name__ == "__main__":
    # Small, tile-friendly shapes: context_length = 8 rows, output_dim = 128 lanes.
    context_length = 8
    output_dim = 128

    module = PositionalEmbeddings(context_length, output_dim,
                                  key=jax.random.PRNGKey(0))
    out = module()
    out = jax.block_until_ready(out)

    # Reference: embedding(arange(L)) is exactly the weight table.
    ref = module.embedding_weight
    assert out.shape == (context_length, output_dim), out.shape
    assert out.dtype == jnp.float32, out.dtype
    assert bool(jnp.allclose(out, ref)), "mismatch vs reference gather"

    # Also sanity-check a larger, multi-tile case (multiple of 8 rows).
    big = PositionalEmbeddings(2048, 256, key=jax.random.PRNGKey(1))
    big_out = jax.block_until_ready(big())
    assert bool(jnp.allclose(big_out, big.embedding_weight)), "mismatch (multi-tile)"

    print("KERNEL_OK")
</pallas_src>

<mosaic_0001>
module attributes {stable_mosaic.version = 11 : i64} {
  func.func @_copy_tile_kernel(%arg0: i32, %arg1: memref<8x128xf32, #tpu.memory_space<vmem>>, %arg2: memref<8x128xf32, #tpu.memory_space<vmem>>) attributes {dimension_semantics = [#tpu.dimension_semantics<parallel>], iteration_bounds = array<i64: 1>, scalar_prefetch = 0 : i64, scratch_operands = 0 : i64, tpu.core_type = #tpu.core_type<tc>, window_params = [{transform_indices = @transform_0, window_bounds = array<i64: 8, 128>}, {transform_indices = @transform_1, window_bounds = array<i64: 8, 128>}]} {
    %c0 = arith.constant 0 : index
    %c0_0 = arith.constant 0 : index
    %0 = vector.load %arg1[%c0, %c0_0] : memref<8x128xf32, #tpu.memory_space<vmem>>, vector<8x128xf32>
    %c0_1 = arith.constant 0 : index
    %c0_2 = arith.constant 0 : index
    %1 = vector.load %arg2[%c0_1, %c0_2] : memref<8x128xf32, #tpu.memory_space<vmem>>, vector<8x128xf32>
    tpu.vector_store %arg2[%c0_1, %c0_2], %0 {strides = array<i32>} : memref<8x128xf32, #tpu.memory_space<vmem>>, vector<8x128xf32>,
    return
  }
  func.func @transform_0(%arg0: i32) -> (i32, i32) {
    %c0_i32 = arith.constant 0 : i32
    %c0_i32_0 = arith.constant 0 : i32
    return %arg0, %c0_i32 : i32, i32
  }
  func.func @transform_1(%arg0: i32) -> (i32, i32) {
    %c0_i32 = arith.constant 0 : i32
    %c0_i32_0 = arith.constant 0 : i32
    return %arg0, %c0_i32 : i32, i32
  }
}

</mosaic_0001>

<bundles_post_ra>
// kernel: tpu_custom_call.1
= control target key start
LH: loop header
LB: loop body
LE: loop exit
PB: predicated region body
PF: predicated region fallthrough
CT: control target
= control target key end

     0   :  { %6 = vsyncpa [#allocation3], 0  ;;  %s124_s0 = inlined_call_operand.hbm [shape: f32[8,128], index: 0, kind: input, shape index: {}]   ;;  %s125_s1 = inlined_call_operand.hbm [shape: f32[8,128], index: 1, kind: output, shape index: {}]  }
   0x1   :  { %7 = vsyncpa [#allocation4], 0  ;;  %s88_s6 = smov [#allocation2]   ;;  %s40_s10 = scalar_lea.hbm %s124_s0, 128 }
   0x2   :  { %s14_s7 = sshll.u32 %s88_s6, 4  ;;  %p41_p0 = scmp.ne.s32.totalorder %s124_s0, %s40_s10  ;;  %s15_s7 = int_to_ptr.vmem [resolvable:$true] %s14_s7 }
   0x3   :  { %p44_p1 = scmp.lt.u32.totalorder %s40_s10, %s124_s0 }
   0x5   :  { %p46_p2 = pnand %p44_p1, %p41_p0 }
   0x7   :  { %49 = shalt.err (!%p46_p2)
}
   0x8   :  { %s50_s15 = scalar_lea.vmem %s15_s7, 128  ;;  %p55_p4 = scmp.lt.s32.totalorder %s15_s7, %s15_s7 }
   0x9   :  { %p51_p3 = scmp.ne.s32.totalorder %s15_s7, %s50_s15  ;;  %p56_p5 = scmp.lt.s32.totalorder %s50_s15, %s50_s15 }
   0xb   :  { %p57_p6 = por %p56_p5, %p55_p4 }
   0xd   :  { %p58_p7 = pnand %p57_p6, %p51_p3 }
   0xf   :  { %61 = shalt.err (!%p58_p7)
}
  0x10   :  { %17 = dma.hbm_to_vmem [thread:$0]  %s124_s0, 128, %s15_s7, [#allocation3]  }
  0x11   :  { %84 = dma.done.wait [#allocation3], 128  }
  0x12   :  { %85 = vsyncadd [#allocation3], 4294967168  ;;  %s89_s18 = smov [#allocation5]   ;;  %v21_v0 = vld [vmem:[#allocation2] sm:$0xff] }
  0x13   :  { %s29_s19 = sshll.u32 %s89_s18, 4  ;;  %22 = vst [vmem:[#allocation5] sm:$0xff] %v21_v0  ;;  %s30_s19 = int_to_ptr.vmem [resolvable:$true] %s29_s19 }
  0x14   :  { %s62_s20 = scalar_lea.vmem %s30_s19, 128  ;;  %p67_p9 = scmp.lt.s32.totalorder %s30_s19, %s30_s19 }
  0x15   :  { %p63_p8 = scmp.ne.s32.totalorder %s30_s19, %s62_s20  ;;  %p68_p10 = scmp.lt.s32.totalorder %s62_s20, %s62_s20 }
  0x17   :  { %p69_p11 = por %p68_p10, %p67_p9 }
  0x19   :  { %p70_p12 = pnand %p69_p11, %p63_p8 }
  0x1b   :  { %73 = shalt.err (!%p70_p12)
}
  0x1c   :  { %s74_s23 = scalar_lea.hbm %s125_s1, 128 }
  0x1d   :  { %p75_p13 = scmp.ne.s32.totalorder %s125_s1, %s74_s23  ;;  %p78_p0 = scmp.lt.u32.totalorder %s74_s23, %s125_s1 }
  0x1f   :  { %p80_p1 = pnand %p78_p0, %p75_p13 }
  0x21   :  { %83 = shalt.err (!%p80_p1)
}
  0x22   :  { %32 = dma.vmem_to_hbm [thread:$0]  %s30_s19, 128, %s125_s1, [#allocation4]  }
  0x23   :  { %86 = dma.done.wait [#allocation4], 128  }
  0x24   :  { %87 = vsyncadd [#allocation4], 4294967168 }
  0x25   :  { %36 = vsyncpa [#allocation3], 1 }
  0x26   :  { %37 = vsyncpa [#allocation4], 1 }

</bundles_post_ra>
